<compile_context>
chip_gen: v5e
topology: v5e:2x2
jax: 0.10.0
libtpu: 0.0.40
codegen_flags: <defaults>
</compile_context>

<pallas_src>
import functools
import math

import jax
import jax.numpy as jnp
from jax import lax
from jax.experimental import pallas as pl
from jax.experimental.pallas import tpu as pltpu


# ----------------------------------------------------------------------------
# Phase 1: KE = (K^T @ E) * scale and VF = F^T @ V, accumulated over S chunks.
# All B batches live in each block so E/F are DMA'd from HBM exactly once.
# ----------------------------------------------------------------------------
def _project_kernel(k_ref, v_ref, e_ref, f_ref, ke_ref, vf_ref,
                    ke_acc, vf_acc, *, scale, batch):
    s = pl.program_id(0)

    @pl.when(s == 0)
    def _():
        ke_acc[...] = jnp.zeros_like(ke_acc)
        vf_acc[...] = jnp.zeros_like(vf_acc)

    e = e_ref[...]          # (ts, Kp_pad)
    f = f_ref[...]          # (ts, Kp_pad)

    # Contract dim 0 of both operands ("A^T @ B"): MXU-native stationary-
    # operand form — no XLU transpose of the (ts, *) tiles.
    dn = (((0,), (0,)), ((), ()))
    for b in range(batch):  # static unroll; B is small for per-head calls
        k = k_ref[b]        # (ts, D)
        v = v_ref[b]        # (ts, D)
        ke_acc[b] += lax.dot_general(k, e, dn,
                                     preferred_element_type=jnp.float32)
        vf_acc[b] += lax.dot_general(f, v, dn,
                                     preferred_element_type=jnp.float32)

    @pl.when(s == pl.num_programs(0) - 1)
    def _():
        # Fold 1/sqrt(dim) into the tiny (D, Kp) tiles rather than the
        # (S, Kp) score matrix.
        ke_ref[...] = (ke_acc[...] * scale).astype(ke_ref.dtype)
        vf_ref[...] = vf_acc[...].astype(vf_ref.dtype)


# ----------------------------------------------------------------------------
# Phase 2: per (batch, Q-chunk): scores -> softmax (padding handled via the
# denominator correction, no -inf mask) -> out = P @ VF.
# ----------------------------------------------------------------------------
def _attend_kernel(q_ref, ke_ref, vf_ref, o_ref, *,
                   kp_valid, kp_pad, approx_recip):
    q = q_ref[0]            # (ts, D)
    ke = ke_ref[0]          # (D, Kp_pad), already scaled by 1/sqrt(dim)
    vf = vf_ref[0]          # (Kp_pad, D)

    scores = jnp.dot(q, ke, preferred_element_type=jnp.float32)  # (ts, Kp_pad)

    # Numerically stable softmax with deferred normalization.  Padded E
    # columns are exactly zero => padded score columns are exactly 0 and the
    # corresponding VF rows are exactly 0, so p @ vf is already correct; only
    # the denominator needs fixing.  (m may include a spurious 0 — still
    # numerically stable.)
    m = jnp.max(scores, axis=-1, keepdims=True)
    p = jnp.exp(scores - m)
    rowsum = jnp.sum(p, axis=-1, keepdims=True)
    if kp_pad > kp_valid:   # static (trace-time) condition
        rowsum = rowsum - float(kp_pad - kp_valid) * jnp.exp(-m)

    out = jnp.dot(p.astype(vf.dtype), vf, preferred_element_type=jnp.float32)
    # approx=True lowers the divide to the otherwise-idle EUP vrcp slot.
    out = out * pl.reciprocal(rowsum, approx=approx_recip)

    # TODO(synk): for production multi-head use, fold H heads into the last
    # dim of Q/out (block (1, ts, H*D) with H*D a multiple of 128) so this
    # store is lane-dense; with the module's single head D < 128 the store is
    # necessarily masked (an in-kernel relayout/transpose would cost more than
    # it saves, and a wrapper-side transpose adds a full HBM pass).
    o_ref[0] = out.astype(o_ref.dtype)


# ----------------------------------------------------------------------------
# Tiling / padding helpers.
# ----------------------------------------------------------------------------
def _round_up(x, m):
    return ((x + m - 1) // m) * m


def _seq_tiling(S, target, multiple):
    """Sequence chunk size, chunk count and padded length.

    ts is a multiple of `multiple` and at most ~target; awkward S is handled
    by zero-padding up to nsc*ts — never a tiny fallback tile, never a huge
    full-S block.
    """
    target = max(multiple, (int(target) // multiple) * multiple)
    ts = min(target, _round_up(S, multiple))
    nsc = -(-S // ts)
    return ts, nsc, nsc * ts


def _pad_dim(x, size, axis):
    if x.shape[axis] == size:
        return x
    pad = [(0, 0)] * x.ndim
    pad[axis] = (0, size - x.shape[axis])
    return jnp.pad(x, pad)


def linear_attention_head(Q, K, V, E, F, *, compute_dtype=None,
                          seq_block=1024, approx_recip=True):
    """Pallas implementation of LinearAttentionHead.forward (eval mode).

    Q, K, V: (B, S, D); E, F: (S, Kp) projection tensors (is_proj_tensor=True).
    compute_dtype: optionally cast inputs (e.g. jnp.bfloat16) to halve HBM
      traffic; matmul accumulation and softmax math stay in f32.
    approx_recip: EUP-approx reciprocal for the softmax denominator (default);
      set False for exact-parity validation runs.
    """
    B, S, D = Q.shape
    kp = E.shape[1]
    out_dtype = Q.dtype

    if compute_dtype is not None:
        Q, K, V, E, F = (x.astype(compute_dtype) for x in (Q, K, V, E, F))
    cdt = Q.dtype
    itemsize = jnp.dtype(cdt).itemsize
    # Sublane packing: f32 -> 8, bf16 -> 16, int8/fp8 -> 32.
    multiple = {4: 8, 2: 16, 1: 32}.get(itemsize, 8)

    # Lane-dense projection dim: zero-pad Kp up to a multiple of 128.
    kp_pad = _round_up(kp, 128)
    E = _pad_dim(E, kp_pad, 1)
    F = _pad_dim(F, kp_pad, 1)

    scale = 1.0 / math.sqrt(float(D))

    # ---- Phase 1 tiling: blocks carry all B batches; keep the double-
    # buffered K+V blocks under ~6 MiB so default scoped-VMEM limits hold.
    kv_budget = 6 * 1024 * 1024
    ts1_cap = max(multiple, kv_budget // max(1, 4 * B * D * itemsize))
    ts1, nsc1, s_pad1 = _seq_tiling(S, min(seq_block, ts1_cap), multiple)
    K1 = _pad_dim(K, s_pad1, 1)
    V1 = _pad_dim(V, s_pad1, 1)
    E1 = _pad_dim(E, s_pad1, 0)
    F1 = _pad_dim(F, s_pad1, 0)

    KE, VF = pl.pallas_call(
        functools.partial(_project_kernel, scale=scale, batch=B),
        out_shape=(
            jax.ShapeDtypeStruct((B, D, kp_pad), cdt),
            jax.ShapeDtypeStruct((B, kp_pad, D), cdt),
        ),
        grid_spec=pltpu.PrefetchScalarGridSpec(
            num_scalar_prefetch=0,
            grid=(nsc1,),
            in_specs=[
                pl.BlockSpec((B, ts1, D), lambda s: (0, s, 0)),      # K
                pl.BlockSpec((B, ts1, D), lambda s: (0, s, 0)),      # V
                pl.BlockSpec((ts1, kp_pad), lambda s: (s, 0)),       # E
                pl.BlockSpec((ts1, kp_pad), lambda s: (s, 0)),       # F
            ],
            out_specs=[
                pl.BlockSpec((B, D, kp_pad), lambda s: (0, 0, 0)),
                pl.BlockSpec((B, kp_pad, D), lambda s: (0, 0, 0)),
            ],
            scratch_shapes=[
                pltpu.VMEM((B, D, kp_pad), jnp.float32),
                pltpu.VMEM((B, kp_pad, D), jnp.float32),
            ],
        ),
        # TODO(synk): on v7x (2 TCs) add a leading parallel split of the S
        # chunks (two partial KE/VF accumulators combined afterwards) so
        # phase 1 uses both TensorCores.
        compiler_params=pltpu.CompilerParams(
            dimension_semantics=("arbitrary",)),
    )(K1, V1, E1, F1)

    # ---- Phase 2: attention over independent (batch, Q-chunk) tiles --------
    ts2, nsc2, s_pad2 = _seq_tiling(S, seq_block, multiple)
    Q2 = _pad_dim(Q, s_pad2, 1)

    out = pl.pallas_call(
        functools.partial(_attend_kernel, kp_valid=kp, kp_pad=kp_pad,
                          approx_recip=approx_recip),
        out_shape=jax.ShapeDtypeStruct((B, s_pad2, D), out_dtype),
        grid_spec=pltpu.PrefetchScalarGridSpec(
            num_scalar_prefetch=0,
            grid=(B, nsc2),
            in_specs=[
                pl.BlockSpec((1, ts2, D), lambda b, s: (b, s, 0)),      # Q
                pl.BlockSpec((1, D, kp_pad), lambda b, s: (b, 0, 0)),   # KE
                pl.BlockSpec((1, kp_pad, D), lambda b, s: (b, 0, 0)),   # VF
            ],
            out_specs=pl.BlockSpec((1, ts2, D), lambda b, s: (b, s, 0)),
        ),
        compiler_params=pltpu.CompilerParams(
            dimension_semantics=("parallel", "parallel")),
    )(Q2, KE, VF)

    if s_pad2 != S:
        out = out[:, :S, :]
    return out


def _reference(Q, K, V, E, F):
    # Pure-JAX reference mirroring the PyTorch forward.
    D = Q.shape[-1]
    Kt = jnp.swapaxes(K, 1, 2)                      # (B, D, S)
    Kp = jnp.matmul(Kt, E)                          # (B, D, Kp)
    scores = jnp.matmul(Q, Kp) / jnp.sqrt(jnp.float32(D))
    P = jax.nn.softmax(scores, axis=-1)             # (B, S, Kp)
    Vt = jnp.swapaxes(V, 1, 2)                      # (B, D, S)
    Vp = jnp.matmul(Vt, F)                          # (B, D, Kp)
    Vp = jnp.swapaxes(Vp, 1, 2)                     # (B, Kp, D)
    return jnp.matmul(P, Vp)                        # (B, S, D)


if __name__ == "__main__":
    def _check(out, ref, atol, rtol):
        assert out.shape == ref.shape, (out.shape, ref.shape)
        err = float(jnp.max(jnp.abs(out.astype(jnp.float32) -
                                    ref.astype(jnp.float32))))
        assert jnp.allclose(out.astype(jnp.float32),
                            ref.astype(jnp.float32),
                            atol=atol, rtol=rtol), err

    key = jax.random.PRNGKey(0)

    # --- Test 1: demo shapes, single chunk ----------------------------------
    B, S, D, KPROJ = 2, 16, 32, 8
    kq, kk, kv, ke_, kf, k2 = jax.random.split(key, 6)
    Q = jax.random.normal(kq, (B, S, D), dtype=jnp.float32)
    K = jax.random.normal(kk, (B, S, D), dtype=jnp.float32)
    V = jax.random.normal(kv, (B, S, D), dtype=jnp.float32)
    E = jax.random.normal(ke_, (S, KPROJ), dtype=jnp.float32) / jnp.sqrt(jnp.float32(S))
    F = jax.random.normal(kf, (S, KPROJ), dtype=jnp.float32) / jnp.sqrt(jnp.float32(S))
    ref = jax.block_until_ready(_reference(Q, K, V, E, F))

    # Exact-reciprocal f32 path — tight tolerance.
    out = jax.block_until_ready(
        linear_attention_head(Q, K, V, E, F, approx_recip=False))
    _check(out, ref, 1e-4, 1e-4)

    # Production default (EUP-approx reciprocal).
    out_a = jax.block_until_ready(linear_attention_head(Q, K, V, E, F))
    _check(out_a, ref, 1e-2, 1e-2)

    # bf16 compute path (halved HBM traffic) — loose tolerance.
    out_b = jax.block_until_ready(
        linear_attention_head(Q, K, V, E, F, compute_dtype=jnp.bfloat16))
    assert out_b.dtype == Q.dtype
    _check(out_b, ref, 1e-1, 1e-1)

    # --- Test 2: multi-chunk accumulation, odd B, ragged S, kp < 128 --------
    B2, S2, D2, KP2 = 3, 40, 32, 24
    kq2, kk2, kv2, ke2, kf2 = jax.random.split(k2, 5)
    Q2 = jax.random.normal(kq2, (B2, S2, D2), dtype=jnp.float32)
    K2 = jax.random.normal(kk2, (B2, S2, D2), dtype=jnp.float32)
    V2 = jax.random.normal(kv2, (B2, S2, D2), dtype=jnp.float32)
    E2 = jax.random.normal(ke2, (S2, KP2), dtype=jnp.float32) / jnp.sqrt(jnp.float32(S2))
    F2 = jax.random.normal(kf2, (S2, KP2), dtype=jnp.float32) / jnp.sqrt(jnp.float32(S2))
    ref2 = jax.block_until_ready(_reference(Q2, K2, V2, E2, F2))

    out2 = jax.block_until_ready(
        linear_attention_head(Q2, K2, V2, E2, F2,
                              seq_block=16, approx_recip=False))
    _check(out2, ref2, 1e-4, 1e-4)

    print("KERNEL_OK")
</pallas_src>

<mosaic_0001>
module attributes {stable_mosaic.version = 11 : i64} {
  func.func @_project_kernel(%arg0: i32, %arg1: memref<2x16x32xf32, #tpu.memory_space<vmem>>, %arg2: memref<2x16x32xf32, #tpu.memory_space<vmem>>, %arg3: memref<16x128xf32, #tpu.memory_space<vmem>>, %arg4: memref<16x128xf32, #tpu.memory_space<vmem>>, %arg5: memref<2x32x128xf32, #tpu.memory_space<vmem>>, %arg6: memref<2x128x32xf32, #tpu.memory_space<vmem>>, %arg7: memref<2x32x128xf32, #tpu.memory_space<vmem>>, %arg8: memref<2x128x32xf32, #tpu.memory_space<vmem>>) attributes {dimension_semantics = [#tpu.dimension_semantics<arbitrary>], iteration_bounds = array<i64: 1>, scalar_prefetch = 0 : i64, scratch_operands = 2 : i64, tpu.core_type = #tpu.core_type<tc>, window_params = [{transform_indices = @transform_0, window_bounds = array<i64: 2, 16, 32>}, {transform_indices = @transform_1, window_bounds = array<i64: 2, 16, 32>}, {transform_indices = @transform_2, window_bounds = array<i64: 16, 128>}, {transform_indices = @transform_3, window_bounds = array<i64: 16, 128>}, {pipeline_mode = #tpu.pipeline_mode<synchronous>, transform_indices = @transform_4, window_bounds = array<i64: 2, 32, 128>}, {pipeline_mode = #tpu.pipeline_mode<synchronous>, transform_indices = @transform_5, window_bounds = array<i64: 2, 128, 32>}]} {
    %c0_i32 = arith.constant 0 : i32
    %0 = arith.cmpi eq, %arg0, %c0_i32 : i32
    %1 = arith.extui %0 : i1 to i32
    %c0_i32_0 = arith.constant 0 : i32
    %2 = arith.cmpi ne, %1, %c0_i32_0 : i32
    scf.if %2 {
      %cst_44 = arith.constant 0.000000e+00 : f32
      %44 = vector.broadcast %cst_44 : f32 to vector<2x32x128xf32>
      %c0_45 = arith.constant 0 : index
      %c0_46 = arith.constant 0 : index
      %c0_47 = arith.constant 0 : index
      %45 = vector.load %arg7[%c0_45, %c0_46, %c0_47] : memref<2x32x128xf32, #tpu.memory_space<vmem>>, vector<2x32x128xf32>
      tpu.vector_store %arg7[%c0_45, %c0_46, %c0_47], %44 {strides = array<i32>} : memref<2x32x128xf32, #tpu.memory_space<vmem>>, vector<2x32x128xf32>,
      %cst_48 = arith.constant 0.000000e+00 : f32
      %46 = vector.broadcast %cst_48 : f32 to vector<2x128x32xf32>
      %c0_49 = arith.constant 0 : index
      %c0_50 = arith.constant 0 : index
      %c0_51 = arith.constant 0 : index
      %47 = vector.load %arg8[%c0_49, %c0_50, %c0_51] : memref<2x128x32xf32, #tpu.memory_space<vmem>>, vector<2x128x32xf32>
      tpu.vector_store %arg8[%c0_49, %c0_50, %c0_51], %46 {strides = array<i32>} : memref<2x128x32xf32, #tpu.memory_space<vmem>>, vector<2x128x32xf32>,
    } else {
    }
    %c0 = arith.constant 0 : index
    %c0_1 = arith.constant 0 : index
    %3 = vector.load %arg3[%c0, %c0_1] : memref<16x128xf32, #tpu.memory_space<vmem>>, vector<16x128xf32>
    %c0_2 = arith.constant 0 : index
    %c0_3 = arith.constant 0 : index
    %4 = vector.load %arg4[%c0_2, %c0_3] : memref<16x128xf32, #tpu.memory_space<vmem>>, vector<16x128xf32>
    %c0_4 = arith.constant 0 : index
    %c0_5 = arith.constant 0 : index
    %c0_6 = arith.constant 0 : index
    %5 = vector.load %arg1[%c0_4, %c0_5, %c0_6] : memref<2x16x32xf32, #tpu.memory_space<vmem>>, vector<1x16x32xf32>
    %6 = vector.shape_cast %5 : vector<1x16x32xf32> to vector<16x32xf32>
    %c0_7 = arith.constant 0 : index
    %c0_8 = arith.constant 0 : index
    %c0_9 = arith.constant 0 : index
    %7 = vector.load %arg2[%c0_7, %c0_8, %c0_9] : memref<2x16x32xf32, #tpu.memory_space<vmem>>, vector<1x16x32xf32>
    %8 = vector.shape_cast %7 : vector<1x16x32xf32> to vector<16x32xf32>
    %c0_10 = arith.constant 0 : index
    %c0_11 = arith.constant 0 : index
    %c0_12 = arith.constant 0 : index
    %9 = vector.load %arg7[%c0_10, %c0_11, %c0_12] : memref<2x32x128xf32, #tpu.memory_space<vmem>>, vector<1x32x128xf32>
    %10 = vector.shape_cast %9 : vector<1x32x128xf32> to vector<32x128xf32>
    %cst = arith.constant dense<0.000000e+00> : vector<32x128xf32>
    %11 = tpu.matmul %6, %3, %cst {dimension_numbers = #tpu.dot_dimension_numbers<[0], [0], [1], [1], [0, 1, 1, 1], [], []>} : vector<16x32xf32>, vector<16x128xf32>, vector<32x128xf32> -> vector<32x128xf32>
    %12 = arith.addf %10, %11 : vector<32x128xf32>
    %c0_13 = arith.constant 0 : index
    %c0_14 = arith.constant 0 : index
    %c0_15 = arith.constant 0 : index
    %13 = vector.load %arg7[%c0_13, %c0_14, %c0_15] : memref<2x32x128xf32, #tpu.memory_space<vmem>>, vector<1x32x128xf32>
    %14 = vector.shape_cast %13 : vector<1x32x128xf32> to vector<32x128xf32>
    %15 = vector.shape_cast %12 : vector<32x128xf32> to vector<1x32x128xf32>
    tpu.vector_store %arg7[%c0_13, %c0_14, %c0_15], %15 {strides = array<i32>} : memref<2x32x128xf32, #tpu.memory_space<vmem>>, vector<1x32x128xf32>,
    %c0_16 = arith.constant 0 : index
    %c0_17 = arith.constant 0 : index
    %c0_18 = arith.constant 0 : index
    %16 = vector.load %arg8[%c0_16, %c0_17, %c0_18] : memref<2x128x32xf32, #tpu.memory_space<vmem>>, vector<1x128x32xf32>
    %17 = vector.shape_cast %16 : vector<1x128x32xf32> to vector<128x32xf32>
    %cst_19 = arith.constant dense<0.000000e+00> : vector<128x32xf32>
    %18 = tpu.matmul %4, %8, %cst_19 {dimension_numbers = #tpu.dot_dimension_numbers<[0], [0], [1], [1], [0, 1, 1, 1], [], []>} : vector<16x128xf32>, vector<16x32xf32>, vector<128x32xf32> -> vector<128x32xf32>
    %19 = arith.addf %17, %18 : vector<128x32xf32>
    %c0_20 = arith.constant 0 : index
    %c0_21 = arith.constant 0 : index
    %c0_22 = arith.constant 0 : index
    %20 = vector.load %arg8[%c0_20, %c0_21, %c0_22] : memref<2x128x32xf32, #tpu.memory_space<vmem>>, vector<1x128x32xf32>
    %21 = vector.shape_cast %20 : vector<1x128x32xf32> to vector<128x32xf32>
    %22 = vector.shape_cast %19 : vector<128x32xf32> to vector<1x128x32xf32>
    tpu.vector_store %arg8[%c0_20, %c0_21, %c0_22], %22 {strides = array<i32>} : memref<2x128x32xf32, #tpu.memory_space<vmem>>, vector<1x128x32xf32>,
    %c1 = arith.constant 1 : index
    %c0_23 = arith.constant 0 : index
    %c0_24 = arith.constant 0 : index
    %23 = vector.load %arg1[%c1, %c0_23, %c0_24] : memref<2x16x32xf32, #tpu.memory_space<vmem>>, vector<1x16x32xf32>
    %24 = vector.shape_cast %23 : vector<1x16x32xf32> to vector<16x32xf32>
    %c1_25 = arith.constant 1 : index
    %c0_26 = arith.constant 0 : index
    %c0_27 = arith.constant 0 : index
    %25 = vector.load %arg2[%c1_25, %c0_26, %c0_27] : memref<2x16x32xf32, #tpu.memory_space<vmem>>, vector<1x16x32xf32>
    %26 = vector.shape_cast %25 : vector<1x16x32xf32> to vector<16x32xf32>
    %c1_28 = arith.constant 1 : index
    %c0_29 = arith.constant 0 : index
    %c0_30 = arith.constant 0 : index
    %27 = vector.load %arg7[%c1_28, %c0_29, %c0_30] : memref<2x32x128xf32, #tpu.memory_space<vmem>>, vector<1x32x128xf32>
    %28 = vector.shape_cast %27 : vector<1x32x128xf32> to vector<32x128xf32>
    %cst_31 = arith.constant dense<0.000000e+00> : vector<32x128xf32>
    %29 = tpu.matmul %24, %3, %cst_31 {dimension_numbers = #tpu.dot_dimension_numbers<[0], [0], [1], [1], [0, 1, 1, 1], [], []>} : vector<16x32xf32>, vector<16x128xf32>, vector<32x128xf32> -> vector<32x128xf32>
    %30 = arith.addf %28, %29 : vector<32x128xf32>
    %c1_32 = arith.constant 1 : index
    %c0_33 = arith.constant 0 : index
    %c0_34 = arith.constant 0 : index
    %31 = vector.load %arg7[%c1_32, %c0_33, %c0_34] : memref<2x32x128xf32, #tpu.memory_space<vmem>>, vector<1x32x128xf32>
    %32 = vector.shape_cast %31 : vector<1x32x128xf32> to vector<32x128xf32>
    %33 = vector.shape_cast %30 : vector<32x128xf32> to vector<1x32x128xf32>
    tpu.vector_store %arg7[%c1_32, %c0_33, %c0_34], %33 {strides = array<i32>} : memref<2x32x128xf32, #tpu.memory_space<vmem>>, vector<1x32x128xf32>,
    %c1_35 = arith.constant 1 : index
    %c0_36 = arith.constant 0 : index
    %c0_37 = arith.constant 0 : index
    %34 = vector.load %arg8[%c1_35, %c0_36, %c0_37] : memref<2x128x32xf32, #tpu.memory_space<vmem>>, vector<1x128x32xf32>
    %35 = vector.shape_cast %34 : vector<1x128x32xf32> to vector<128x32xf32>
    %cst_38 = arith.constant dense<0.000000e+00> : vector<128x32xf32>
    %36 = tpu.matmul %4, %26, %cst_38 {dimension_numbers = #tpu.dot_dimension_numbers<[0], [0], [1], [1], [0, 1, 1, 1], [], []>} : vector<16x128xf32>, vector<16x32xf32>, vector<128x32xf32> -> vector<128x32xf32>
    %37 = arith.addf %35, %36 : vector<128x32xf32>
    %c1_39 = arith.constant 1 : index
    %c0_40 = arith.constant 0 : index
    %c0_41 = arith.constant 0 : index
    %38 = vector.load %arg8[%c1_39, %c0_40, %c0_41] : memref<2x128x32xf32, #tpu.memory_space<vmem>>, vector<1x128x32xf32>
    %39 = vector.shape_cast %38 : vector<1x128x32xf32> to vector<128x32xf32>
    %40 = vector.shape_cast %37 : vector<128x32xf32> to vector<1x128x32xf32>
    tpu.vector_store %arg8[%c1_39, %c0_40, %c0_41], %40 {strides = array<i32>} : memref<2x128x32xf32, #tpu.memory_space<vmem>>, vector<1x128x32xf32>,
    %c0_i32_42 = arith.constant 0 : i32
    %41 = arith.cmpi eq, %arg0, %c0_i32_42 : i32
    %42 = arith.extui %41 : i1 to i32
    %c0_i32_43 = arith.constant 0 : i32
    %43 = arith.cmpi ne, %42, %c0_i32_43 : i32
    scf.if %43 {
      %c0_44 = arith.constant 0 : index
      %c0_45 = arith.constant 0 : index
      %c0_46 = arith.constant 0 : index
      %44 = vector.load %arg7[%c0_44, %c0_45, %c0_46] : memref<2x32x128xf32, #tpu.memory_space<vmem>>, vector<2x32x128xf32>
      %cst_47 = arith.constant 0.176776692 : f32
      %45 = vector.broadcast %cst_47 : f32 to vector<2x32x128xf32>
      %46 = arith.mulf %44, %45 : vector<2x32x128xf32>
      %c0_48 = arith.constant 0 : index
      %c0_49 = arith.constant 0 : index
      %c0_50 = arith.constant 0 : index
      %47 = vector.load %arg5[%c0_48, %c0_49, %c0_50] : memref<2x32x128xf32, #tpu.memory_space<vmem>>, vector<2x32x128xf32>
      tpu.vector_store %arg5[%c0_48, %c0_49, %c0_50], %46 {strides = array<i32>} : memref<2x32x128xf32, #tpu.memory_space<vmem>>, vector<2x32x128xf32>,
      %c0_51 = arith.constant 0 : index
      %c0_52 = arith.constant 0 : index
      %c0_53 = arith.constant 0 : index
      %48 = vector.load %arg8[%c0_51, %c0_52, %c0_53] : memref<2x128x32xf32, #tpu.memory_space<vmem>>, vector<2x128x32xf32>
      %c0_54 = arith.constant 0 : index
      %c0_55 = arith.constant 0 : index
      %c0_56 = arith.constant 0 : index
      %49 = vector.load %arg6[%c0_54, %c0_55, %c0_56] : memref<2x128x32xf32, #tpu.memory_space<vmem>>, vector<2x128x32xf32>
      tpu.vector_store %arg6[%c0_54, %c0_55, %c0_56], %48 {strides = array<i32>} : memref<2x128x32xf32, #tpu.memory_space<vmem>>, vector<2x128x32xf32>,
    } else {
    }
    return
  }
  func.func @transform_0(%arg0: i32) -> (i32, i32, i32) {
    %c0_i32 = arith.constant 0 : i32
    %c0_i32_0 = arith.constant 0 : i32
    %c0_i32_1 = arith.constant 0 : i32
    return %c0_i32, %arg0, %c0_i32_0 : i32, i32, i32
  }
  func.func @transform_1(%arg0: i32) -> (i32, i32, i32) {
    %c0_i32 = arith.constant 0 : i32
    %c0_i32_0 = arith.constant 0 : i32
    %c0_i32_1 = arith.constant 0 : i32
    return %c0_i32, %arg0, %c0_i32_0 : i32, i32, i32
  }
  func.func @transform_2(%arg0: i32) -> (i32, i32) {
    %c0_i32 = arith.constant 0 : i32
    %c0_i32_0 = arith.constant 0 : i32
    return %arg0, %c0_i32 : i32, i32
  }
  func.func @transform_3(%arg0: i32) -> (i32, i32) {
    %c0_i32 = arith.constant 0 : i32
    %c0_i32_0 = arith.constant 0 : i32
    return %arg0, %c0_i32 : i32, i32
  }
  func.func @transform_4(%arg0: i32) -> (i32, i32, i32) {
    %c0_i32 = arith.constant 0 : i32
    %c0_i32_0 = arith.constant 0 : i32
    %c0_i32_1 = arith.constant 0 : i32
    %c0_i32_2 = arith.constant 0 : i32
    return %c0_i32, %c0_i32_0, %c0_i32_1 : i32, i32, i32
  }
  func.func @transform_5(%arg0: i32) -> (i32, i32, i32) {
    %c0_i32 = arith.constant 0 : i32
    %c0_i32_0 = arith.constant 0 : i32
    %c0_i32_1 = arith.constant 0 : i32
    %c0_i32_2 = arith.constant 0 : i32
    return %c0_i32, %c0_i32_0, %c0_i32_1 : i32, i32, i32
  }
}

</mosaic_0001>

<bundles_post_ra>
// kernel: tpu_custom_call.1
= control target key start
LH: loop header
LB: loop body
LE: loop exit
PB: predicated region body
PF: predicated region fallthrough
CT: control target
= control target key end

     0   :  { %11 = vsyncpa [#allocation5], 0  ;;  %s1218_s0 = inlined_call_operand.hbm [shape: f32[2,16,32], index: 0, kind: input, shape index: {}]   ;;  %s1219_s1 = inlined_call_operand.hbm [shape: f32[2,16,32], index: 1, kind: input, shape index: {}]   ;;  %s1220_s2 = inlined_call_operand.hbm [shape: f32[16,128], index: 2, kind: input, shape index: {}]   ;;  %s1221_s3 = inlined_call_operand.hbm [shape: f32[16,128], index: 3, kind: input, shape index: {}]   ;;  %s1222_s4 = inlined_call_operand.hbm [shape: f32[2,32,128], index: 4, kind: output, shape index: {0}]   ;;  %s1223_s5 = inlined_call_operand.vmem [shape: f32[2,128,32], index: 5, kind: output, shape index: {1}]  }
   0x1   :  { %12 = vsyncpa [#allocation8], 0 }
   0x2   :  { %13 = vsyncpa [#allocation11], 0 }
   0x3   :  { %14 = vsyncpa [#allocation6], 0  ;;  %s32_s20 = sshll.u32 %s1219_s1, 4  ;;  %s918_s21 = smov [#allocation7]   ;;  %s33_s20 = int_to_ptr.hbm [resolvable:$true] %s32_s20 }
   0x4   :  { %s34_s22 = sshll.u32 %s918_s21, 4  ;;  %s19_s25 = sshll.u32 %s1218_s0, 4  ;;  %s35_s22 = int_to_ptr.vmem [resolvable:$true] %s34_s22  ;;  %s20_s25 = int_to_ptr.hbm [resolvable:$true] %s19_s25 }
   0x5   :  { %s919_s26 = smov 128   ;;  %s920_s27 = smov 8  }
   0x6   :  { %40 = dma.hbm_to_vmem [thread:$0]  %s33_s20, 512, %s35_s22, [#allocation8], %s919_s26, %s919_s26, %s920_s27  }
   0x7   :  { %s921_s28 = smov [#allocation4]   ;;  %s45_s1 = sshll.u32 %s1220_s2, 4  ;;  %s46_s1 = int_to_ptr.hbm [resolvable:$true] %s45_s1 }
   0x8   :  { %s21_s29 = sshll.u32 %s921_s28, 4  ;;  %s58_s8 = sshll.u32 %s1221_s3, 4  ;;  %s22_s29 = int_to_ptr.vmem [resolvable:$true] %s21_s29  ;;  %s59_s8 = int_to_ptr.hbm [resolvable:$true] %s58_s8 }
   0x9   :  { %27 = dma.hbm_to_vmem [thread:$0]  %s20_s25, 512, %s22_s29, [#allocation5], %s919_s26, %s919_s26, %s920_s27  }
   0xa   :  { %s922_s9 = smov [#allocation9]   ;;  %s923_s11 = smov [#allocation10]  }
   0xb   :  { %s47_s10 = sshll.u32 %s922_s9, 4  ;;  %s60_s2 = sshll.u32 %s923_s11, 4  ;;  %s48_s10 = int_to_ptr.vmem [resolvable:$true] %s47_s10  ;;  %s61_s2 = int_to_ptr.vmem [resolvable:$true] %s60_s2 }
   0xc   :  { %53 = dma.hbm_to_vmem [thread:$0]  %s46_s1, 256, %s48_s10, [#allocation8], %s919_s26, %s919_s26, %s920_s27  }
   0xd   :  { %66 = dma.hbm_to_vmem [thread:$0]  %s59_s8, 256, %s61_s2, [#allocation11], %s919_s26, %s919_s26, %s920_s27  }
   0xe   :  { %910 = dma.done.wait [#allocation5], 512  }
   0xf   :  { %911 = vsyncadd [#allocation5], 4294966784 }
  0x10   :  { %912 = dma.done.wait [#allocation8], 768  }
  0x11   :  { %913 = vsyncadd [#allocation8], 4294966528 }
  0x12   :  { %914 = dma.done.wait [#allocation11], 256  }
  0x13   :  { %915 = vsyncadd [#allocation11], 4294967040  ;;  %v417_v0 = vld [vmem:[#allocation4 + $0x10] sm:$0xff]  ;;  %v132_v1 = vld [vmem:[#allocation4] sm:$0xff]  ;;  %vm172_vm0 = vcmask 130048   ;;  %vm95_vm1 = vcmask 261120  }
  0x14   :  { %v130_v2 = vld [vmem:[#allocation10] sm:$0xff]  ;;  %427 = vxpose.xlu1.b32.start [1/2] (short) (narrow) %v417_v0, 32  ;;  %140 = vxpose.xlu2.b32.start [1/2] (short) (narrow) %v132_v1, 32  ;;  %v129_v3 = vld [vmem:[#allocation9 + $0x8] sm:$0xff]  ;;  %v418_v4 = vld [vmem:[#allocation4 + $0x18] sm:$0xff]  ;;  %v924_v34 = vmov 0.0  }
  0x15   :  { %238 = vxpose.xlu0.b32.start [1/2] (short) %v130_v2, 128  ;;  %199 = vmatpush.msra.mxu0 %v129_v3  ;;  %v133_v5 = vld [vmem:[#allocation4 + $0x8] sm:$0xff]  ;;  %v131_v6 = vld [vmem:[#allocation10 + $0x8] sm:$0xff]  ;;  %v128_v7 = vld [vmem:[#allocation9] sm:$0xff]  ;;  %96 = vst.msk [vmem:[#allocation3] sm:$0xff] %vm95_vm1, %v924_v34  ;;  %s925_s3 = smov [#allocation12]   ;;  %s719_s15 = sshll.u32 %s1222_s4, 4  ;;  %s720_s15 = int_to_ptr.hbm [resolvable:$true] %s719_s15 }
  0x16   :  { %485 = vmatpush.msra.mxu2 %v129_v3  ;;  %v135_v8 = vld [vmem:[#allocation7 + $0x8] sm:$0xff]  ;;  %v134_v9 = vld [vmem:[#allocation7] sm:$0xff]  ;;  %v421_v12 = vld [vmem:[#allocation7 + $0x18] sm:$0xff]  ;;  %97 = vst.msk [vmem:[#allocation3 + $0x8] sm:$0xff] %vm95_vm1, %v924_v34  ;;  %s717_s12 = sshll.u32 %s925_s3, 4  ;;  %s718_s12 = int_to_ptr.vmem [resolvable:$true] %s717_s12 }
  0x17   :  { %200 = vmatpush.msra.mxu0 %v128_v7  ;;  %778 = vmatpush.msra.mxu1 %v135_v8  ;;  %v420_v14 = vld [vmem:[#allocation7 + $0x10] sm:$0xff]  ;;  %98 = vst.msk [vmem:[#allocation3 + $0x10] sm:$0xff] %vm95_vm1, %v924_v34 }
  0x18   :  { %486 = vmatpush.msra.mxu2 %v128_v7  ;;  %780 = vmatpush.msra.mxu3 %v421_v12  ;;  %99 = vst.msk [vmem:[#allocation3 + $0x18] sm:$0xff] %vm95_vm1, %v924_v34 }
  0x19   :  { %332 = vmatpush.msrb.mxu0 %v135_v8  ;;  %779 = vmatpush.msra.mxu1 %v134_v9  ;;  %100 = vst.msk [vmem:[#allocation3 + $0x20] sm:$0xff] %vm95_vm1, %v924_v34 }
  0x1a   :  { %539 = vmatpush.msrb.mxu2 %v421_v12  ;;  %781 = vmatpush.msra.mxu3 %v420_v14  ;;  %101 = vst.msk [vmem:[#allocation3 + $0x28] sm:$0xff] %vm95_vm1, %v924_v34 }
  0x1b   :  { %333 = vmatpush.msrb.mxu0 %v134_v9  ;;  %102 = vst.msk [vmem:[#allocation3 + $0x30] sm:$0xff] %vm95_vm1, %v924_v34 }
  0x1c   :  { %428 = vxpose.xlu1.b32.end [2/2] (short) (narrow) %v418_v4, 32  ;;  %141 = vxpose.xlu2.b32.end [2/2] (short) (narrow) %v133_v5, 32  ;;  %103 = vst.msk [vmem:[#allocation3 + $0x38] sm:$0xff] %vm95_vm1, %v924_v34  ;;  %v222_v49 = vld [vmem:[#allocation3] sm:$0xff] }
  0x1d   :  { %239 = vxpose.xlu0.b32.end [2/2] (short) %v131_v6, 128  ;;  %540 = vmatpush.msrb.mxu2 %v420_v14  ;;  %104 = vst.msk [vmem:[#allocation3 + $0x40] sm:$0xff] %vm95_vm1, %v924_v34  ;;  %v223_v54 = vld [vmem:[#allocation3 + $0x8] sm:$0xff] }
  0x1e   :  { %105 = vst.msk [vmem:[#allocation3 + $0x48] sm:$0xff] %vm95_vm1, %v924_v34  ;;  %v224_v60 = vld [vmem:[#allocation3 + $0x10] sm:$0xff] }
  0x1f   :  { %106 = vst.msk [vmem:[#allocation3 + $0x50] sm:$0xff] %vm95_vm1, %v924_v34  ;;  %v225_v3 = vld [vmem:[#allocation3 + $0x18] sm:$0xff] }
  0x20   :  { %107 = vst.msk [vmem:[#allocation3 + $0x58] sm:$0xff] %vm95_vm1, %v924_v34  ;;  %v226_v14 = vld [vmem:[#allocation3 + $0x20] sm:$0xff] }
  0x21   :  { %108 = vst.msk [vmem:[#allocation3 + $0x60] sm:$0xff] %vm95_vm1, %v924_v34 }
  0x22   :  { %109 = vst.msk [vmem:[#allocation3 + $0x68] sm:$0xff] %vm95_vm1, %v924_v34 }
  0x23   :  { %110 = vst.msk [vmem:[#allocation3 + $0x70] sm:$0xff] %vm95_vm1, %v924_v34 }
  0x24   :  { %111 = vst.msk [vmem:[#allocation3 + $0x78] sm:$0xff] %vm95_vm1, %v924_v34 }
  0x25   :  { %112 = vst.msk [vmem:[#allocation3 + $0x80] sm:$0xff] %vm95_vm1, %v924_v34 }
  0x26   :  { %113 = vst.msk [vmem:[#allocation3 + $0x88] sm:$0xff] %vm95_vm1, %v924_v34 }
  0x27   :  { %114 = vst.msk [vmem:[#allocation3 + $0x90] sm:$0xff] %vm95_vm1, %v924_v34 }
  0x28   :  { %115 = vst.msk [vmem:[#allocation3 + $0x98] sm:$0xff] %vm95_vm1, %v924_v34 }
  0x29   :  { %116 = vst.msk [vmem:[#allocation3 + $0xa0] sm:$0xff] %vm95_vm1, %v924_v34 }
  0x2a   :  { %117 = vst.msk [vmem:[#allocation3 + $0xa8] sm:$0xff] %vm95_vm1, %v924_v34 }
  0x2b   :  { %118 = vst.msk [vmem:[#allocation3 + $0xb0] sm:$0xff] %vm95_vm1, %v924_v34 }
  0x2c   :  { %119 = vst.msk [vmem:[#allocation3 + $0xb8] sm:$0xff] %vm95_vm1, %v924_v34  ;;  %v509_v61 = vld [vmem:[#allocation3 + $0x80] sm:$0xff] }
  0x2d   :  { %120 = vst.msk [vmem:[#allocation3 + $0xc0] sm:$0xff] %vm95_vm1, %v924_v34  ;;  %v510_v4 = vld [vmem:[#allocation3 + $0x88] sm:$0xff] }
  0x2e   :  { %121 = vst.msk [vmem:[#allocation3 + $0xc8] sm:$0xff] %vm95_vm1, %v924_v34 }
  0x2f   :  { %122 = vst.msk [vmem:[#allocation3 + $0xd0] sm:$0xff] %vm95_vm1, %v924_v34 }
  0x30   :  { %123 = vst.msk [vmem:[#allocation3 + $0xd8] sm:$0xff] %vm95_vm1, %v924_v34 }
  0x31   :  { %124 = vst.msk [vmem:[#allocation3 + $0xe0] sm:$0xff] %vm95_vm1, %v924_v34 }
  0x32   :  { %125 = vst.msk [vmem:[#allocation3 + $0xe8] sm:$0xff] %vm95_vm1, %v924_v34 }
  0x33   :  { %126 = vst.msk [vmem:[#allocation3 + $0xf0] sm:$0xff] %vm95_vm1, %v924_v34 }
  0x34   :  { %127 = vst.msk [vmem:[#allocation3 + $0xf8] sm:$0xff] %vm95_vm1, %v924_v34 }
  0xad   :  { %v156_v10 = vpop.trf.xlu2 }
  0xae   :  { %738 = vmatmul.msk.f32.vlgmr.msra.gmra.mxu0 %vm172_vm0, %v156_v10  ;;  %v228_v10 = vld [vmem:[#allocation3 + $0x30] sm:$0xff] }
  0xb5   :  { %v157_v11 = vpop.trf.xlu2 }
  0xb6   :  { %739 = vmatmul.msk.f32.gmra.mxu0 %vm172_vm0, %v157_v11 }
  0xb8   :  { %v443_v13 = vpop.trf.xlu1 }
  0xb9   :  { %v254_v15 = vpop.trf.xlu0  ;;  %758 = vmatmul.msk.f32.vlgmr.msra.gmra.mxu2 %vm172_vm0, %v443_v13 }
  0xbd   :  { %v158_v16 = vpop.trf.xlu2 }
  0xbe   :  { %740 = vmatmul.msk.f32.gmra.mxu0 %vm172_vm0, %v158_v16 }
  0xc0   :  { %v444_v17 = vpop.trf.xlu1 }
  0xc1   :  { %v255_v18 = vpop.trf.xlu0  ;;  %759 = vmatmul.msk.f32.gmra.mxu2 %vm172_vm0, %v444_v17 }
  0xc5   :  { %v159_v19 = vpop.trf.xlu2 }
  0xc6   :  { %741 = vmatmul.msk.f32.gmra.mxu0 %vm172_vm0, %v159_v19  ;;  %v515_v19 = vld [vmem:[#allocation3 + $0xb0] sm:$0xff] }
  0xc8   :  { %v445_v20 = vpop.trf.xlu1 }
  0xc9   :  { %v256_v21 = vpop.trf.xlu0  ;;  %760 = vmatmul.msk.f32.gmra.mxu2 %vm172_vm0, %v445_v20 }
  0xce   :  { %742 = vmatmul.msk.f32.vlgmr.msrb.gmra.mxu0 %vm172_vm0, %v254_v15 }
  0xd0   :  { %v446_v22 = vpop.trf.xlu1 }
  0xd1   :  { %v257_v23 = vpop.trf.xlu0  ;;  %761 = vmatmul.msk.f32.gmra.mxu2 %vm172_vm0, %v446_v22  ;;  %v229_v22 = vld [vmem:[#allocation3 + $0x38] sm:$0xff] }
  0xd6   :  { %743 = vmatmul.msk.f32.gmra.mxu0 %vm172_vm0, %v255_v18 }
  0xd9   :  { %v258_v24 = vpop.trf.xlu0  ;;  %762 = vmatmul.msk.f32.vlgmr.msrb.gmra.mxu2 %vm172_vm0, %v254_v15  ;;  %v511_v15 = vld [vmem:[#allocation3 + $0x90] sm:$0xff] }
  0xde   :  { %744 = vmatmul.msk.f32.gmra.mxu0 %vm172_vm0, %v256_v21 }
  0xe1   :  { %v259_v25 = vpop.trf.xlu0  ;;  %763 = vmatmul.msk.f32.gmra.mxu2 %vm172_vm0, %v255_v18 }
  0xe6   :  { %745 = vmatmul.msk.f32.gmra.mxu0 %vm172_vm0, %v257_v23 }
  0xe9   :  { %v260_v26 = vpop.trf.xlu0  ;;  %764 = vmatmul.msk.f32.gmra.mxu2 %vm172_vm0, %v256_v21 }
  0xea   :  { %748 = vmatmul.msk.f32.vlgmr.msra.gmra.mxu1 %vm172_vm0, %v260_v26  ;;  %768 = vmatmul.msk.f32.vlgmr.msra.gmra.mxu3 %vm172_vm0, %v260_v26 }
  0xee   :  { %746 = vmatmul.msk.f32.gmra.mxu0 %vm172_vm0, %v258_v24 }
  0xf1   :  { %v261_v27 = vpop.trf.xlu0  ;;  %765 = vmatmul.msk.f32.gmra.mxu2 %vm172_vm0, %v257_v23 }
  0xf2   :  { %749 = vmatmul.msk.f32.gmra.mxu1 %vm172_vm0, %v261_v27  ;;  %769 = vmatmul.msk.f32.gmra.mxu3 %vm172_vm0, %v261_v27 }
  0xf6   :  { %747 = vmatmul.msk.f32.gmra.mxu0 %vm172_vm0, %v259_v25 }
  0xf9   :  { %v262_v28 = vpop.trf.xlu0  ;;  %766 = vmatmul.msk.f32.gmra.mxu2 %vm172_vm0, %v258_v24 }
  0xfa   :  { %750 = vmatmul.msk.f32.gmra.mxu1 %vm172_vm0, %v262_v28  ;;  %770 = vmatmul.msk.f32.gmra.mxu3 %vm172_vm0, %v262_v28 }
 0x101   :  { %v263_v29 = vpop.trf.xlu0  ;;  %767 = vmatmul.msk.f32.gmra.mxu2 %vm172_vm0, %v259_v25 }
 0x102   :  { %751 = vmatmul.msk.f32.gmra.mxu1 %vm172_vm0, %v263_v29  ;;  %771 = vmatmul.msk.f32.gmra.mxu3 %vm172_vm0, %v263_v29  ;;  %v227_v29 = vld [vmem:[#allocation3 + $0x28] sm:$0xff] }
 0x109   :  { %v264_v30 = vpop.trf.xlu0 }
 0x10a   :  { %752 = vmatmul.msk.f32.gmra.mxu1 %vm172_vm0, %v264_v30  ;;  %772 = vmatmul.msk.f32.gmra.mxu3 %vm172_vm0, %v264_v30  ;;  %v512_v30 = vld [vmem:[#allocation3 + $0x98] sm:$0xff] }
 0x111   :  { %v265_v31 = vpop.trf.xlu0 }
 0x112   :  { %753 = vmatmul.msk.f32.gmra.mxu1 %vm172_vm0, %v265_v31  ;;  %773 = vmatmul.msk.f32.gmra.mxu3 %vm172_vm0, %v265_v31 }
 0x119   :  { %v266_v32 = vpop.trf.xlu0 }
 0x11a   :  { %754 = vmatmul.msk.f32.gmra.mxu1 %vm172_vm0, %v266_v32  ;;  %774 = vmatmul.msk.f32.gmra.mxu3 %vm172_vm0, %v266_v32  ;;  %v516_v32 = vld [vmem:[#allocation3 + $0xb8] sm:$0xff] }
 0x121   :  { %v267_v33 = vpop.trf.xlu0 }
 0x122   :  { %755 = vmatmul.msk.f32.gmra.mxu1 %vm172_vm0, %v267_v33  ;;  %775 = vmatmul.msk.f32.gmra.mxu3 %vm172_vm0, %v267_v33 }
 0x129   :  { %v268_v35 = vpop.trf.xlu0 }
 0x12a   :  { %756 = vmatmul.msk.f32.gmra.mxu1 %vm172_vm0, %v268_v35  ;;  %776 = vmatmul.msk.f32.gmra.mxu3 %vm172_vm0, %v268_v35 }
 0x12b   :  { %v202_v36 = vpop.f32.mrf.mxu0 }
 0x12c   :  { %v633_v37 = vmul.f32 0.17677669, %v202_v36 }
 0x12e   :  { %641 = vst [vmem:[#allocation12] sm:$0xff] %v633_v37 }
 0x131   :  { %v269_v38 = vpop.trf.xlu0 }
 0x132   :  { %757 = vmatmul.msk.f32.gmra.mxu1 %vm172_vm0, %v269_v38  ;;  %777 = vmatmul.msk.f32.gmra.mxu3 %vm172_vm0, %v269_v38 }
 0x133   :  { %v205_v39 = vpop.f32.mrf.mxu0 }
 0x134   :  { %v634_v40 = vmul.f32 0.17677669, %v205_v39  ;;  %v230_v39 = vld [vmem:[#allocation3 + $0x40] sm:$0xff] }
 0x136   :  { %642 = vst [vmem:[#allocation12 + $0x8] sm:$0xff] %v634_v40 }
 0x13b   :  { %v208_v41 = vpop.f32.mrf.mxu0 }
 0x13c   :  { %v635_v42 = vmul.f32 0.17677669, %v208_v41  ;;  %v488_v43 = vpop.f32.mrf.mxu2 }
 0x13d   :  { %v637_v44 = vmul.f32 0.17677669, %v488_v43 }
 0x13e   :  { %643 = vst [vmem:[#allocation12 + $0x10] sm:$0xff] %v635_v42 }
 0x13f   :  { %645 = vst [vmem:[#allocation12 + $0x20] sm:$0xff] %v637_v44  ;;  %v513_v44 = vld [vmem:[#allocation3 + $0xa0] sm:$0xff] }
 0x143   :  { %v211_v45 = vpop.f32.mrf.mxu0 }
 0x144   :  { %v636_v46 = vmul.f32 0.17677669, %v211_v45  ;;  %v491_v47 = vpop.f32.mrf.mxu2 }
 0x145   :  { %v638_v48 = vmul.f32 0.17677669, %v491_v47  ;;  %v517_v47 = vld [vmem:[#allocation3 + $0xc0] sm:$0xff] }
 0x146   :  { %644 = vst [vmem:[#allocation12 + $0x18] sm:$0xff] %v636_v46 }
 0x147   :  { %646 = vst [vmem:[#allocation12 + $0x28] sm:$0xff] %v638_v48 }
 0x14b   :  { %v335_v50 = vpop.f32.mrf.mxu0 }
 0x14c   :  { %v383_v51 = vadd.f32 %v335_v50, %v222_v49  ;;  %v494_v52 = vpop.f32.mrf.mxu2  ;;  %v231_v50 = vld [vmem:[#allocation3 + $0x48] sm:$0xff] }
 0x14d   :  { %v639_v53 = vmul.f32 0.17677669, %v494_v52 }
 0x14e   :  { %400 = vst.msk [vmem:[#allocation3] sm:$0xff] %vm95_vm1, %v383_v51 }
 0x14f   :  { %647 = vst [vmem:[#allocation12 + $0x30] sm:$0xff] %v639_v53 }
 0x153   :  { %v338_v55 = vpop.f32.mrf.mxu0 }
 0x154   :  { %v384_v56 = vadd.f32 %v338_v55, %v223_v54  ;;  %v497_v57 = vpop.f32.mrf.mxu2 }
 0x155   :  { %v649_v58 = vld [vmem:[#allocation3] sm:$0xff]  ;;  %v640_v59 = vmul.f32 0.17677669, %v497_v57  ;;  %v514_v57 = vld [vmem:[#allocation3 + $0xa8] sm:$0xff] }
 0x156   :  { %681 = vst.msk [vmem:[%s1223_s5] sm:$0xff] %vm95_vm1, %v649_v58  ;;  %v518_v58 = vld [vmem:[#allocation3 + $0xc8] sm:$0xff] }
 0x157   :  { %401 = vst.msk [vmem:[#allocation3 + $0x8] sm:$0xff] %vm95_vm1, %v384_v56 }
 0x158   :  { %648 = vst [vmem:[#allocation12 + $0x38] sm:$0xff] %v640_v59 }
 0x159   :  { %725 = dma.vmem_to_hbm [thread:$0]  %s718_s12, 1024, %s720_s15, [#allocation6], %s919_s26, %s919_s26, %s920_s27  }
 0x15b   :  { %v341_v62 = vpop.f32.mrf.mxu0 }
 0x15c   :  { %v385_v63 = vadd.f32 %v341_v62, %v224_v60  ;;  %v542_v0 = vpop.f32.mrf.mxu2 }
 0x15d   :  { %v590_v1 = vadd.f32 %v542_v0, %v509_v61 }
 0x15e   :  { %v650_v2 = vld [vmem:[#allocation3 + $0x8] sm:$0xff]  ;;  %402 = vst.msk [vmem:[#allocation3 + $0x10] sm:$0xff] %vm95_vm1, %v385_v63  ;;  %v232_v63 = vld [vmem:[#allocation3 + $0x50] sm:$0xff] }
 0x15f   :  { %682 = vst.msk [vmem:[%s1223_s5 + $0x8] sm:$0xff] %vm95_vm1, %v650_v2 }
 0x160   :  { %606 = vst.msk [vmem:[#allocation3 + $0x80] sm:$0xff] %vm95_vm1, %v590_v1 }
 0x163   :  { %v344_v5 = vpop.f32.mrf.mxu0 }
 0x164   :  { %v386_v6 = vadd.f32 %v344_v5, %v225_v3  ;;  %v545_v7 = vpop.f32.mrf.mxu2 }
 0x165   :  { %v651_v8 = vld [vmem:[#allocation3 + $0x10] sm:$0xff]  ;;  %v591_v9 = vadd.f32 %v545_v7, %v510_v4 }
 0x166   :  { %683 = vst.msk [vmem:[%s1223_s5 + $0x10] sm:$0xff] %vm95_vm1, %v651_v8  ;;  %v233_v8 = vld [vmem:[#allocation3 + $0x58] sm:$0xff] }
 0x167   :  { %v665_v11 = vld [vmem:[#allocation3 + $0x80] sm:$0xff]  ;;  %403 = vst.msk [vmem:[#allocation3 + $0x18] sm:$0xff] %vm95_vm1, %v386_v6  ;;  %v353_v12 = vpop.f32.mrf.mxu1  ;;  %v519_v6 = vld [vmem:[#allocation3 + $0xd0] sm:$0xff] }
 0x168   :  { %697 = vst.msk [vmem:[%s1223_s5 + $0x80] sm:$0xff] %vm95_vm1, %v665_v11  ;;  %v389_v13 = vadd.f32 %v353_v12, %v228_v10 }
 0x169   :  { %607 = vst.msk [vmem:[#allocation3 + $0x88] sm:$0xff] %vm95_vm1, %v591_v9 }
 0x16a   :  { %406 = vst.msk [vmem:[#allocation3 + $0x30] sm:$0xff] %vm95_vm1, %v389_v13 }
 0x16b   :  { %v347_v16 = vpop.f32.mrf.mxu0 }
 0x16c   :  { %v387_v17 = vadd.f32 %v347_v16, %v226_v14  ;;  %v548_v18 = vpop.f32.mrf.mxu2 }
 0x16d   :  { %v592_v20 = vadd.f32 %v548_v18, %v511_v15  ;;  %v560_v21 = vpop.f32.mrf.mxu3  ;;  %v520_v15 = vld [vmem:[#allocation3 + $0xd8] sm:$0xff] }
 0x16e   :  { %v652_v23 = vld [vmem:[#allocation3 + $0x18] sm:$0xff]  ;;  %404 = vst.msk [vmem:[#allocation3 + $0x20] sm:$0xff] %vm95_vm1, %v387_v17  ;;  %v596_v24 = vadd.f32 %v560_v21, %v515_v19  ;;  %v234_v17 = vld [vmem:[#allocation3 + $0x60] sm:$0xff] }
 0x16f   :  { %684 = vst.msk [vmem:[%s1223_s5 + $0x18] sm:$0xff] %vm95_vm1, %v652_v23  ;;  %v356_v25 = vpop.f32.mrf.mxu1  ;;  %v521_v23 = vld [vmem:[#allocation3 + $0xe0] sm:$0xff] }
 0x170   :  { %v666_v26 = vld [vmem:[#allocation3 + $0x88] sm:$0xff]  ;;  %608 = vst.msk [vmem:[#allocation3 + $0x90] sm:$0xff] %vm95_vm1, %v592_v20  ;;  %v390_v27 = vadd.f32 %v356_v25, %v229_v22 }
 0x171   :  { %698 = vst.msk [vmem:[%s1223_s5 + $0x88] sm:$0xff] %vm95_vm1, %v666_v26  ;;  %v655_v28 = vld [vmem:[#allocation3 + $0x30] sm:$0xff]  ;;  %v235_v25 = vld [vmem:[#allocation3 + $0x68] sm:$0xff] }
 0x172   :  { %687 = vst.msk [vmem:[%s1223_s5 + $0x30] sm:$0xff] %vm95_vm1, %v655_v28 }
 0x173   :  { %612 = vst.msk [vmem:[#allocation3 + $0xb0] sm:$0xff] %vm95_vm1, %v596_v24  ;;  %v350_v31 = vpop.f32.mrf.mxu0 }
 0x174   :  { %407 = vst.msk [vmem:[#allocation3 + $0x38] sm:$0xff] %vm95_vm1, %v390_v27  ;;  %v388_v33 = vadd.f32 %v350_v31, %v227_v29  ;;  %v551_v34 = vpop.f32.mrf.mxu2  ;;  %v522_v31 = vld [vmem:[#allocation3 + $0xe8] sm:$0xff] }
 0x175   :  { %v653_v35 = vld [vmem:[#allocation3 + $0x20] sm:$0xff]  ;;  %v593_v36 = vadd.f32 %v551_v34, %v512_v30  ;;  %v563_v37 = vpop.f32.mrf.mxu3 }
 0x176   :  { %685 = vst.msk [vmem:[%s1223_s5 + $0x20] sm:$0xff] %vm95_vm1, %v653_v35  ;;  %v597_v38 = vadd.f32 %v563_v37, %v516_v32 }
 0x177   :  { %v667_v40 = vld [vmem:[#allocation3 + $0x90] sm:$0xff]  ;;  %405 = vst.msk [vmem:[#allocation3 + $0x28] sm:$0xff] %vm95_vm1, %v388_v33  ;;  %v359_v41 = vpop.f32.mrf.mxu1 }
 0x178   :  { %699 = vst.msk [vmem:[%s1223_s5 + $0x90] sm:$0xff] %vm95_vm1, %v667_v40  ;;  %v391_v42 = vadd.f32 %v359_v41, %v230_v39  ;;  %v236_v33 = vld [vmem:[#allocation3 + $0x70] sm:$0xff]  ;;  %v237_v41 = vld [vmem:[#allocation3 + $0x78] sm:$0xff] }
 0x179   :  { %609 = vst.msk [vmem:[#allocation3 + $0x98] sm:$0xff] %vm95_vm1, %v593_v36  ;;  %v523_v39 = vld [vmem:[#allocation3 + $0xf0] sm:$0xff] }
 0x17a   :  { %v671_v43 = vld [vmem:[#allocation3 + $0xb0] sm:$0xff]  ;;  %613 = vst.msk [vmem:[#allocation3 + $0xb8] sm:$0xff] %vm95_vm1, %v597_v38 }
 0x17b   :  { %703 = vst.msk [vmem:[%s1223_s5 + $0xb0] sm:$0xff] %vm95_vm1, %v671_v43  ;;  %v656_v45 = vld [vmem:[#allocation3 + $0x38] sm:$0xff] }
 0x17c   :  { %688 = vst.msk [vmem:[%s1223_s5 + $0x38] sm:$0xff] %vm95_vm1, %v656_v45  ;;  %v554_v46 = vpop.f32.mrf.mxu2 }
 0x17d   :  { %408 = vst.msk [vmem:[#allocation3 + $0x40] sm:$0xff] %vm95_vm1, %v391_v42  ;;  %v594_v48 = vadd.f32 %v554_v46, %v513_v44  ;;  %v566_v49 = vpop.f32.mrf.mxu3 }
 0x17e   :  { %v654_v51 = vld [vmem:[#allocation3 + $0x28] sm:$0xff]  ;;  %v598_v52 = vadd.f32 %v566_v49, %v517_v47  ;;  %v524_v47 = vld [vmem:[#allocation3 + $0xf8] sm:$0xff] }
 0x17f   :  { %686 = vst.msk [vmem:[%s1223_s5 + $0x28] sm:$0xff] %vm95_vm1, %v654_v51  ;;  %v362_v53 = vpop.f32.mrf.mxu1 }
 0x180   :  { %v668_v54 = vld [vmem:[#allocation3 + $0x98] sm:$0xff]  ;;  %610 = vst.msk [vmem:[#allocation3 + $0xa0] sm:$0xff] %vm95_vm1, %v594_v48  ;;  %v392_v55 = vadd.f32 %v362_v53, %v231_v50 }
 0x181   :  { %700 = vst.msk [vmem:[%s1223_s5 + $0x98] sm:$0xff] %vm95_vm1, %v668_v54  ;;  %v672_v56 = vld [vmem:[#allocation3 + $0xb8] sm:$0xff] }
 0x182   :  { %704 = vst.msk [vmem:[%s1223_s5 + $0xb8] sm:$0xff] %vm95_vm1, %v672_v56 }
 0x183   :  { %614 = vst.msk [vmem:[#allocation3 + $0xc0] sm:$0xff] %vm95_vm1, %v598_v52 }
 0x184   :  { %v657_v59 = vld [vmem:[#allocation3 + $0x40] sm:$0xff]  ;;  %409 = vst.msk [vmem:[#allocation3 + $0x48] sm:$0xff] %vm95_vm1, %v392_v55  ;;  %v557_v60 = vpop.f32.mrf.mxu2 }
 0x185   :  { %689 = vst.msk [vmem:[%s1223_s5 + $0x40] sm:$0xff] %vm95_vm1, %v657_v59  ;;  %v595_v61 = vadd.f32 %v557_v60, %v514_v57  ;;  %v569_v62 = vpop.f32.mrf.mxu3 }
 0x186   :  { %v599_v0 = vadd.f32 %v569_v62, %v518_v58 }
 0x187   :  { %v669_v1 = vld [vmem:[#allocation3 + $0xa0] sm:$0xff]  ;;  %611 = vst.msk [vmem:[#allocation3 + $0xa8] sm:$0xff] %vm95_vm1, %v595_v61  ;;  %v365_v2 = vpop.f32.mrf.mxu1 }
 0x188   :  { %701 = vst.msk [vmem:[%s1223_s5 + $0xa0] sm:$0xff] %vm95_vm1, %v669_v1  ;;  %v393_v3 = vadd.f32 %v365_v2, %v232_v63 }
 0x189   :  { %615 = vst.msk [vmem:[#allocation3 + $0xc8] sm:$0xff] %vm95_vm1, %v599_v0 }
 0x18a   :  { %v673_v4 = vld [vmem:[#allocation3 + $0xc0] sm:$0xff]  ;;  %410 = vst.msk [vmem:[#allocation3 + $0x50] sm:$0xff] %vm95_vm1, %v393_v3 }
 0x18b   :  { %705 = vst.msk [vmem:[%s1223_s5 + $0xc0] sm:$0xff] %vm95_vm1, %v673_v4  ;;  %v658_v5 = vld [vmem:[#allocation3 + $0x48] sm:$0xff] }
 0x18c   :  { %690 = vst.msk [vmem:[%s1223_s5 + $0x48] sm:$0xff] %vm95_vm1, %v658_v5 }
 0x18d   :  { %v572_v7 = vpop.f32.mrf.mxu3 }
 0x18e   :  { %v670_v9 = vld [vmem:[#allocation3 + $0xa8] sm:$0xff]  ;;  %v600_v10 = vadd.f32 %v572_v7, %v519_v6 }
 0x18f   :  { %702 = vst.msk [vmem:[%s1223_s5 + $0xa8] sm:$0xff] %vm95_vm1, %v670_v9  ;;  %v368_v11 = vpop.f32.mrf.mxu1 }
 0x190   :  { %v674_v12 = vld [vmem:[#allocation3 + $0xc8] sm:$0xff]  ;;  %616 = vst.msk [vmem:[#allocation3 + $0xd0] sm:$0xff] %vm95_vm1, %v600_v10  ;;  %v394_v13 = vadd.f32 %v368_v11, %v233_v8 }
 0x191   :  { %706 = vst.msk [vmem:[%s1223_s5 + $0xc8] sm:$0xff] %vm95_vm1, %v674_v12  ;;  %v659_v14 = vld [vmem:[#allocation3 + $0x50] sm:$0xff] }
 0x192   :  { %691 = vst.msk [vmem:[%s1223_s5 + $0x50] sm:$0xff] %vm95_vm1, %v659_v14 }
 0x193   :  { %411 = vst.msk [vmem:[#allocation3 + $0x58] sm:$0xff] %vm95_vm1, %v394_v13 }
 0x195   :  { %v575_v16 = vpop.f32.mrf.mxu3 }
 0x196   :  { %v601_v18 = vadd.f32 %v575_v16, %v520_v15 }
 0x197   :  { %v675_v19 = vld [vmem:[#allocation3 + $0xd0] sm:$0xff]  ;;  %v371_v20 = vpop.f32.mrf.mxu1 }
 0x198   :  { %707 = vst.msk [vmem:[%s1223_s5 + $0xd0] sm:$0xff] %vm95_vm1, %v675_v19  ;;  %v395_v21 = vadd.f32 %v371_v20, %v234_v17 }
 0x199   :  { %617 = vst.msk [vmem:[#allocation3 + $0xd8] sm:$0xff] %vm95_vm1, %v601_v18 }
 0x19a   :  { %v660_v22 = vld [vmem:[#allocation3 + $0x58] sm:$0xff]  ;;  %412 = vst.msk [vmem:[#allocation3 + $0x60] sm:$0xff] %vm95_vm1, %v395_v21 }
 0x19b   :  { %692 = vst.msk [vmem:[%s1223_s5 + $0x58] sm:$0xff] %vm95_vm1, %v660_v22 }
 0x19d   :  { %v578_v24 = vpop.f32.mrf.mxu3 }
 0x19e   :  { %v602_v26 = vadd.f32 %v578_v24, %v521_v23 }
 0x19f   :  { %v374_v27 = vpop.f32.mrf.mxu1 }
 0x1a0   :  { %v676_v28 = vld [vmem:[#allocation3 + $0xd8] sm:$0xff]  ;;  %618 = vst.msk [vmem:[#allocation3 + $0xe0] sm:$0xff] %vm95_vm1, %v602_v26  ;;  %v396_v29 = vadd.f32 %v374_v27, %v235_v25 }
 0x1a1   :  { %708 = vst.msk [vmem:[%s1223_s5 + $0xd8] sm:$0xff] %vm95_vm1, %v676_v28  ;;  %v661_v30 = vld [vmem:[#allocation3 + $0x60] sm:$0xff] }
 0x1a2   :  { %693 = vst.msk [vmem:[%s1223_s5 + $0x60] sm:$0xff] %vm95_vm1, %v661_v30 }
 0x1a3   :  { %413 = vst.msk [vmem:[#allocation3 + $0x68] sm:$0xff] %vm95_vm1, %v396_v29 }
 0x1a5   :  { %v581_v32 = vpop.f32.mrf.mxu3 }
 0x1a6   :  { %v603_v34 = vadd.f32 %v581_v32, %v522_v31 }
 0x1a7   :  { %v677_v35 = vld [vmem:[#allocation3 + $0xe0] sm:$0xff]  ;;  %v377_v36 = vpop.f32.mrf.mxu1 }
 0x1a8   :  { %709 = vst.msk [vmem:[%s1223_s5 + $0xe0] sm:$0xff] %vm95_vm1, %v677_v35  ;;  %v397_v37 = vadd.f32 %v377_v36, %v236_v33 }
 0x1a9   :  { %619 = vst.msk [vmem:[#allocation3 + $0xe8] sm:$0xff] %vm95_vm1, %v603_v34 }
 0x1aa   :  { %v662_v38 = vld [vmem:[#allocation3 + $0x68] sm:$0xff]  ;;  %414 = vst.msk [vmem:[#allocation3 + $0x70] sm:$0xff] %vm95_vm1, %v397_v37 }
 0x1ab   :  { %694 = vst.msk [vmem:[%s1223_s5 + $0x68] sm:$0xff] %vm95_vm1, %v662_v38 }
 0x1ad   :  { %v584_v40 = vpop.f32.mrf.mxu3 }
 0x1ae   :  { %v604_v42 = vadd.f32 %v584_v40, %v523_v39 }
 0x1af   :  { %v380_v43 = vpop.f32.mrf.mxu1 }
 0x1b0   :  { %v678_v44 = vld [vmem:[#allocation3 + $0xe8] sm:$0xff]  ;;  %620 = vst.msk [vmem:[#allocation3 + $0xf0] sm:$0xff] %vm95_vm1, %v604_v42  ;;  %v398_v45 = vadd.f32 %v380_v43, %v237_v41 }
 0x1b1   :  { %710 = vst.msk [vmem:[%s1223_s5 + $0xe8] sm:$0xff] %vm95_vm1, %v678_v44  ;;  %v663_v46 = vld [vmem:[#allocation3 + $0x70] sm:$0xff] }
 0x1b2   :  { %695 = vst.msk [vmem:[%s1223_s5 + $0x70] sm:$0xff] %vm95_vm1, %v663_v46 }
 0x1b3   :  { %415 = vst.msk [vmem:[#allocation3 + $0x78] sm:$0xff] %vm95_vm1, %v398_v45 }
 0x1b5   :  { %v587_v48 = vpop.f32.mrf.mxu3 }
 0x1b6   :  { %v605_v49 = vadd.f32 %v587_v48, %v524_v47 }
 0x1b7   :  { %v679_v50 = vld [vmem:[#allocation3 + $0xf0] sm:$0xff] }
 0x1b8   :  { %711 = vst.msk [vmem:[%s1223_s5 + $0xf0] sm:$0xff] %vm95_vm1, %v679_v50 }
 0x1b9   :  { %621 = vst.msk [vmem:[#allocation3 + $0xf8] sm:$0xff] %vm95_vm1, %v605_v49 }
 0x1ba   :  { %v664_v51 = vld [vmem:[#allocation3 + $0x78] sm:$0xff] }
 0x1bb   :  { %696 = vst.msk [vmem:[%s1223_s5 + $0x78] sm:$0xff] %vm95_vm1, %v664_v51 }
 0x1c0   :  { %v680_v52 = vld [vmem:[#allocation3 + $0xf8] sm:$0xff] }
 0x1c1   :  { %712 = vst.msk [vmem:[%s1223_s5 + $0xf8] sm:$0xff] %vm95_vm1, %v680_v52 }
 0x1c2   :  { %916 = dma.done.wait [#allocation6], 1024  }
 0x1c3   :  { %917 = vsyncadd [#allocation6], 4294966272 }
 0x1c4   :  { %734 = vsyncpa [#allocation5], 1 }
 0x1c5   :  { %735 = vsyncpa [#allocation8], 1 }
 0x1c6   :  { %736 = vsyncpa [#allocation11], 1 }
 0x1c7   :  { %737 = vsyncpa [#allocation6], 1 }

</bundles_post_ra>
